<compile_context>
chip_gen: v5e
topology: v5e:2x2
jax: 0.10.0
libtpu: 0.0.40
codegen_flags: <defaults>
</compile_context>

<pallas_src>
import functools

import jax
import jax.numpy as jnp
import numpy as np
from jax.experimental import pallas as pl
from jax.experimental.pallas import tpu as pltpu


# ----------------------------- Pallas kernel ------------------------------ #

def make_decoder_kernel(n_layers: int, hid_dim: int, batch: int, vocab: int):
    L, H, B, V = n_layers, hid_dim, batch, vocab

    def kernel(ids_ref,          # (B, 1)   int32 token ids
               emb_ref,          # (V, E)   embedding table (VMEM resident)
               state_ref,        # (B, 2LH) packed [h_0..h_{L-1} | c_0..c_{L-1}]
               bo_ref,           # (1, V)   output bias
               ctx_ref,          # (B, LH)  packed attention context ("cell")
               *rest):
        layer_refs = rest[:2 * L]            # per layer: W_l=(in_l+H,4H) pre-transposed, b_l=(1,4H)
        wa_ref = rest[2 * L]                 # (2H, H)  attention linear_out, pre-transposed
        wo_ref = rest[2 * L + 1]             # (2H, V)  output projection, pre-transposed
        pred_ref = rest[2 * L + 2]           # (B, V)
        state_out_ref = rest[2 * L + 3]      # (B, 2LH)

        # ---- embedding gather as a one-hot MXU matmul ----------------------
        # (dropout in eval mode == identity)
        ids = ids_ref[...]                                          # (B, 1)
        vocab_iota = jax.lax.broadcasted_iota(jnp.int32, (B, V), 1)
        one_hot = (vocab_iota == ids).astype(jnp.float32)           # (B, V)
        x = jnp.dot(one_hot, emb_ref[...],
                    preferred_element_type=jnp.float32)             # (B, E)

        # lane mask for the "g" gate lanes, hoisted out of the layer loop
        gate_lane = jax.lax.broadcasted_iota(jnp.int32, (B, 4 * H), 1)
        is_g_lane = (gate_lane >= 2 * H) & (gate_lane < 3 * H)

        # ---- multi-layer LSTM, single time step ---------------------------
        h_new, c_new = [], []
        for l in range(L):
            w = layer_refs[2 * l][...]                      # (in_l + H, 4H)
            b_g = layer_refs[2 * l + 1][...]                # (1, 4H)  (b_ih + b_hh)
            h_prev = state_ref[:, l * H:(l + 1) * H]        # (B, H)
            c_prev = state_ref[:, (L + l) * H:(L + l + 1) * H]

            # one fused MXU push per layer: [x | h_prev] @ [Wih | Whh]^T
            gates = jnp.dot(jnp.concatenate([x, h_prev], axis=-1), w,
                            preferred_element_type=jnp.float32) + b_g   # (B, 4H)

            # single tanh over the whole (B,4H) vreg; sigmoid recovered exactly
            # as 0.5*(tanh(x/2)+1) on the i/f/o lanes (VPU select + FMA).
            pre = jnp.where(is_g_lane, gates, gates * 0.5)
            t = jnp.tanh(pre)
            act = jnp.where(is_g_lane, t, 0.5 * (t + 1.0))
            i_g = act[:, 0 * H:1 * H]
            f_g = act[:, 1 * H:2 * H]
            g_g = act[:, 2 * H:3 * H]
            o_g = act[:, 3 * H:4 * H]

            c_l = f_g * c_prev + i_g * g_g
            h_l = o_g * jnp.tanh(c_l)
            h_new.append(h_l)
            c_new.append(c_l)
            x = h_l                                         # feed next layer

        # single lane-dense (B, 2*L*H) store of the packed state
        state_out_ref[...] = jnp.concatenate(h_new + c_new, axis=-1)

        output = x                                          # (B, H) LSTM output

        # ---- dot attention over the L context ("cell") vectors ------------
        ctx_l = [ctx_ref[:, l * H:(l + 1) * H] for l in range(L)]
        scores = [jnp.sum(output * c, axis=-1, keepdims=True) for c in ctx_l]   # (B,1)
        m = functools.reduce(jnp.maximum, scores)
        exps = [jnp.exp(s - m) for s in scores]
        denom = functools.reduce(lambda a, b: a + b, exps)
        inv_denom = pl.reciprocal(denom, approx=True)       # EUP slot
        mix = functools.reduce(lambda a, b: a + b,
                               [e * c for e, c in zip(exps, ctx_l)]) * inv_denom

        # fused attention linear_out (no bias): tanh([mix | output] @ Wa^T)
        attn_out = jnp.tanh(
            jnp.dot(jnp.concatenate([mix, output], axis=-1), wa_ref[...],
                    preferred_element_type=jnp.float32))

        # fused output projection: [attn_out | output] @ Wo^T + b  (sublane
        # broadcast of the (1,V) bias is free on the VPU)
        pred_ref[...] = (
            jnp.dot(jnp.concatenate([attn_out, output], axis=-1), wo_ref[...],
                    preferred_element_type=jnp.float32)
            + bo_ref[...])

    return kernel


# ------------------------------- wrappers ----------------------------------- #

def prepare_decoder_params(params, weights_dtype=jnp.float32):
    """One-time weight prep (pre-transposed / pre-fused).

    Run OUTSIDE the per-step jit so the transposes/concats are not re-executed
    for every decoded token.
    """
    L = len(params["w_ih"])
    H = params["w_hh"][0].shape[1]
    V = params["w_out"].shape[0]
    layers = []
    for l in range(L):
        w_fused = jnp.concatenate(
            [params["w_ih"][l].T, params["w_hh"][l].T], axis=0)       # (in_l + H, 4H)
        b_fused = (params["b_ih"][l] + params["b_hh"][l]).reshape(1, 4 * H)
        layers.append((w_fused.astype(weights_dtype),
                       b_fused.astype(jnp.float32)))
    return {
        "emb": params["embedding"].astype(weights_dtype),             # (V, E)
        "layers": layers,
        "wa": params["w_attn"].T.astype(weights_dtype),               # (2H, H)
        "wo": params["w_out"].T.astype(weights_dtype),                # (2H, V)
        "bo": params["b_out"].reshape(1, V).astype(jnp.float32),      # (1, V)
    }


def pack_state(h, c):
    """(L,B,H),(L,B,H) -> lane-dense (B, 2LH). Do this once at loop entry."""
    L, B, H = h.shape
    return jnp.concatenate(
        [jnp.transpose(h, (1, 0, 2)).reshape(B, L * H),
         jnp.transpose(c, (1, 0, 2)).reshape(B, L * H)], axis=-1)


def unpack_state(state, n_layers, hid_dim):
    """(B, 2LH) -> (L,B,H),(L,B,H). Do this once at loop exit."""
    B = state.shape[0]
    h = state[:, :n_layers * hid_dim].reshape(B, n_layers, hid_dim).transpose(1, 0, 2)
    c = state[:, n_layers * hid_dim:].reshape(B, n_layers, hid_dim).transpose(1, 0, 2)
    return h, c


def pack_context(context):
    """(L,B,H) -> (B, LH)."""
    L, B, H = context.shape
    return jnp.transpose(context, (1, 0, 2)).reshape(B, L * H)


@jax.jit
def decoder_step(prepped, token_ids, state_packed, ctx_packed):
    """One decoder step on the packed lane-dense state.

    `prepped` comes from prepare_decoder_params() (already fused/transposed);
    the only per-step wrapper op here is the (B,) -> (B,1) id reshape.
    """
    B = token_ids.shape[0]
    L = len(prepped["layers"])
    H = prepped["wa"].shape[1]
    V, _E = prepped["emb"].shape

    ids2d = token_ids.astype(jnp.int32).reshape(B, 1)

    tensor_inputs = [ids2d, prepped["emb"], state_packed, prepped["bo"], ctx_packed]
    for w, b in prepped["layers"]:
        tensor_inputs += [w, b]
    tensor_inputs += [prepped["wa"], prepped["wo"]]

    out_shapes = (
        jax.ShapeDtypeStruct((B, V), jnp.float32),                   # prediction
        jax.ShapeDtypeStruct((B, 2 * L * H), jnp.float32),           # packed [h | c]
    )

    def full_spec(shape):
        nd = len(shape)
        return pl.BlockSpec(shape, lambda i, _nd=nd: (0,) * _nd)

    pred, state_out = pl.pallas_call(
        make_decoder_kernel(L, H, B, V),
        out_shape=out_shapes,
        grid=(1,),
        in_specs=[full_spec(x.shape) for x in tensor_inputs],
        out_specs=tuple(full_spec(s.shape) for s in out_shapes),
        # input 2 (packed state in) aliases output 1 (packed state out):
        # inputs are [ids2d, emb, state_in, bo, ctx, W0,b0, ..., wa, wo].
        input_output_aliases={2: 1},
        compiler_params=pltpu.CompilerParams(
            dimension_semantics=("arbitrary",),
            vmem_limit_bytes=32 * 1024 * 1024),
    )(*tensor_inputs)
    return pred, state_out


def decoder_forward(params, token_ids, h0, c0, context, prepped=None):
    """Convenience wrapper matching Decoder.forward(input, hidden, cell)."""
    if prepped is None:
        prepped = prepare_decoder_params(params)
    L, _, H = h0.shape
    pred, state_out = decoder_step(prepped, token_ids,
                                   pack_state(h0, c0), pack_context(context))
    h_n, c_n = unpack_state(state_out, L, H)
    return pred, (h_n, c_n)


# --------------------------- pure-JAX reference ---------------------------- #

_P_HI = jax.lax.Precision.HIGHEST   # exact-f32 reference matmuls


def decoder_reference(params, token_ids, h0, c0, context):
    x = jnp.take(params["embedding"], token_ids, axis=0)
    H = h0.shape[-1]
    hs, cs = [], []
    for l in range(h0.shape[0]):
        b = params["b_ih"][l] + params["b_hh"][l]
        gates = (jnp.dot(x, params["w_ih"][l].T, precision=_P_HI)
                 + jnp.dot(h0[l], params["w_hh"][l].T, precision=_P_HI) + b)
        i = jax.nn.sigmoid(gates[:, :H])
        f = jax.nn.sigmoid(gates[:, H:2 * H])
        g = jnp.tanh(gates[:, 2 * H:3 * H])
        o = jax.nn.sigmoid(gates[:, 3 * H:])
        c = f * c0[l] + i * g
        h = o * jnp.tanh(c)
        hs.append(h); cs.append(c)
        x = h
    output = x
    ctx = jnp.transpose(context, (1, 0, 2))                  # (B, L, H)
    q = output[:, None, :]                                   # (B, 1, H)
    scores = jnp.einsum("bqh,blh->bql", q, ctx, precision=_P_HI)
    w = jax.nn.softmax(scores, axis=-1)
    mix = jnp.einsum("bql,blh->bqh", w, ctx, precision=_P_HI)
    combined = jnp.concatenate([mix, q], axis=-1)            # (B, 1, 2H)
    attn = jnp.tanh(jnp.einsum("bqk,hk->bqh", combined, params["w_attn"],
                               precision=_P_HI))[:, 0, :]
    final = jnp.concatenate([attn, output], axis=-1)         # (B, 2H)
    pred = jnp.dot(final, params["w_out"].T, precision=_P_HI) + params["b_out"]
    return pred, (jnp.stack(hs), jnp.stack(cs))


# --------------------------------- main ------------------------------------ #

if __name__ == "__main__":
    # small, tile-friendly shapes consistent with the module
    OUTPUT_DIM = 128      # vocab size
    EMB_DIM = 32
    HID_DIM = 32
    N_LAYERS = 2
    BATCH = 8

    ks = jax.random.split(jax.random.PRNGKey(0), 20)
    k_lstm = 1.0 / np.sqrt(HID_DIM)
    k_out = 1.0 / np.sqrt(2 * HID_DIM)

    params = {
        "embedding": jax.random.normal(ks[0], (OUTPUT_DIM, EMB_DIM), jnp.float32),
        "w_ih": [
            jax.random.uniform(ks[1 + l], (4 * HID_DIM, EMB_DIM if l == 0 else HID_DIM),
                               jnp.float32, -k_lstm, k_lstm)
            for l in range(N_LAYERS)],
        "w_hh": [
            jax.random.uniform(ks[4 + l], (4 * HID_DIM, HID_DIM),
                               jnp.float32, -k_lstm, k_lstm)
            for l in range(N_LAYERS)],
        "b_ih": [
            jax.random.uniform(ks[7 + l], (4 * HID_DIM,), jnp.float32, -k_lstm, k_lstm)
            for l in range(N_LAYERS)],
        "b_hh": [
            jax.random.uniform(ks[10 + l], (4 * HID_DIM,), jnp.float32, -k_lstm, k_lstm)
            for l in range(N_LAYERS)],
        # torchnlp Attention(dot): linear_out is (H, 2H), no bias
        "w_attn": jax.random.uniform(ks[13], (HID_DIM, 2 * HID_DIM),
                                     jnp.float32, -k_out, k_out),
        # self.out: Linear(2H -> V)
        "w_out": jax.random.uniform(ks[14], (OUTPUT_DIM, 2 * HID_DIM),
                                    jnp.float32, -k_out, k_out),
        "b_out": jax.random.uniform(ks[15], (OUTPUT_DIM,), jnp.float32, -k_out, k_out),
    }

    token_ids = jax.random.randint(ks[16], (BATCH,), 0, OUTPUT_DIM, dtype=jnp.int32)
    h0 = jax.random.normal(ks[17], (N_LAYERS, BATCH, HID_DIM), jnp.float32)
    c0 = jax.random.normal(ks[18], (N_LAYERS, BATCH, HID_DIM), jnp.float32)
    cell_ctx = jax.random.normal(ks[19], (N_LAYERS, BATCH, HID_DIM), jnp.float32)

    # one-time weight prep, outside the per-step jit
    prepped = jax.tree_util.tree_map(jnp.asarray, prepare_decoder_params(params))

    pred, (h_n, c_n) = decoder_forward(params, token_ids, h0, c0, cell_ctx,
                                       prepped=prepped)
    jax.block_until_ready((pred, h_n, c_n))

    pred_ref, (h_ref, c_ref) = decoder_reference(params, token_ids, h0, c0, cell_ctx)
    # All-f32 path; tolerance leaves headroom for MXU pass-structure differences
    # vs. the HIGHEST-precision reference and for the approx. EUP reciprocal in
    # the softmax (typical observed error << 1e-3).
    np.testing.assert_allclose(np.asarray(pred), np.asarray(pred_ref), rtol=1e-2, atol=1e-2)
    np.testing.assert_allclose(np.asarray(h_n), np.asarray(h_ref), rtol=1e-2, atol=1e-2)
    np.testing.assert_allclose(np.asarray(c_n), np.asarray(c_ref), rtol=1e-2, atol=1e-2)

    print("KERNEL_OK")
</pallas_src>

<mosaic_0001>
module attributes {stable_mosaic.version = 11 : i64} {
  func.func @kernel(%arg0: i32, %arg1: memref<8x1xi32, #tpu.memory_space<vmem>>, %arg2: memref<128x32xf32, #tpu.memory_space<vmem>>, %arg3: memref<8x128xf32, #tpu.memory_space<vmem>>, %arg4: memref<1x128xf32, #tpu.memory_space<vmem>>, %arg5: memref<8x64xf32, #tpu.memory_space<vmem>>, %arg6: memref<64x128xf32, #tpu.memory_space<vmem>>, %arg7: memref<1x128xf32, #tpu.memory_space<vmem>>, %arg8: memref<64x128xf32, #tpu.memory_space<vmem>>, %arg9: memref<1x128xf32, #tpu.memory_space<vmem>>, %arg10: memref<64x32xf32, #tpu.memory_space<vmem>>, %arg11: memref<64x128xf32, #tpu.memory_space<vmem>>, %arg12: memref<8x128xf32, #tpu.memory_space<vmem>>, %arg13: memref<8x128xf32, #tpu.memory_space<vmem>>) attributes {dimension_semantics = [#tpu.dimension_semantics<arbitrary>], iteration_bounds = array<i64: 1>, scalar_prefetch = 0 : i64, scratch_operands = 0 : i64, tpu.core_type = #tpu.core_type<tc>, window_params = [{pipeline_mode = #tpu.pipeline_mode<synchronous>, transform_indices = @transform_0, window_bounds = array<i64: 8, 1>}, {pipeline_mode = #tpu.pipeline_mode<synchronous>, transform_indices = @transform_1, window_bounds = array<i64: 128, 32>}, {pipeline_mode = #tpu.pipeline_mode<synchronous>, transform_indices = @transform_2, window_bounds = array<i64: 8, 128>}, {pipeline_mode = #tpu.pipeline_mode<synchronous>, transform_indices = @transform_3, window_bounds = array<i64: 1, 128>}, {pipeline_mode = #tpu.pipeline_mode<synchronous>, transform_indices = @transform_4, window_bounds = array<i64: 8, 64>}, {pipeline_mode = #tpu.pipeline_mode<synchronous>, transform_indices = @transform_5, window_bounds = array<i64: 64, 128>}, {pipeline_mode = #tpu.pipeline_mode<synchronous>, transform_indices = @transform_6, window_bounds = array<i64: 1, 128>}, {pipeline_mode = #tpu.pipeline_mode<synchronous>, transform_indices = @transform_7, window_bounds = array<i64: 64, 128>}, {pipeline_mode = #tpu.pipeline_mode<synchronous>, transform_indices = @transform_8, window_bounds = array<i64: 1, 128>}, {pipeline_mode = #tpu.pipeline_mode<synchronous>, transform_indices = @transform_9, window_bounds = array<i64: 64, 32>}, {pipeline_mode = #tpu.pipeline_mode<synchronous>, transform_indices = @transform_10, window_bounds = array<i64: 64, 128>}, {pipeline_mode = #tpu.pipeline_mode<synchronous>, transform_indices = @transform_11, window_bounds = array<i64: 8, 128>}, {pipeline_mode = #tpu.pipeline_mode<synchronous>, transform_indices = @transform_12, window_bounds = array<i64: 8, 128>}]} {
    %c0 = arith.constant 0 : index
    %c0_0 = arith.constant 0 : index
    %0 = vector.load %arg1[%c0, %c0_0] : memref<8x1xi32, #tpu.memory_space<vmem>>, vector<8x1xi32>
    %1 = tpu.iota {dimensions = array<i32: 1>} : vector<8x128xi32>
    %2 = vector.broadcast %0 : vector<8x1xi32> to vector<8x128xi32>
    %3 = arith.cmpi eq, %1, %2 : vector<8x128xi32>
    %4 = arith.extui %3 : vector<8x128xi1> to vector<8x128xi32>
    %5 = arith.sitofp %4 : vector<8x128xi32> to vector<8x128xf32>
    %c0_1 = arith.constant 0 : index
    %c0_2 = arith.constant 0 : index
    %6 = vector.load %arg2[%c0_1, %c0_2] : memref<128x32xf32, #tpu.memory_space<vmem>>, vector<128x32xf32>
    %cst = arith.constant dense<0.000000e+00> : vector<8x32xf32>
    %7 = tpu.matmul %5, %6, %cst {dimension_numbers = #tpu.dot_dimension_numbers<[1], [0], [0], [1], [0, 0, 1, 1], [], []>} : vector<8x128xf32>, vector<128x32xf32>, vector<8x32xf32> -> vector<8x32xf32>
    %8 = tpu.iota {dimensions = array<i32: 1>} : vector<8x128xi32>
    %c64_i32 = arith.constant 64 : i32
    %9 = vector.broadcast %c64_i32 : i32 to vector<8x128xi32>
    %10 = arith.cmpi sge, %8, %9 : vector<8x128xi32>
    %c96_i32 = arith.constant 96 : i32
    %11 = vector.broadcast %c96_i32 : i32 to vector<8x128xi32>
    %12 = arith.cmpi slt, %8, %11 : vector<8x128xi32>
    %13 = arith.andi %10, %12 : vector<8x128xi1>
    %c0_3 = arith.constant 0 : index
    %c0_4 = arith.constant 0 : index
    %14 = vector.load %arg6[%c0_3, %c0_4] : memref<64x128xf32, #tpu.memory_space<vmem>>, vector<64x128xf32>
    %c0_5 = arith.constant 0 : index
    %c0_6 = arith.constant 0 : index
    %15 = vector.load %arg7[%c0_5, %c0_6] : memref<1x128xf32, #tpu.memory_space<vmem>>, vector<1x128xf32>
    %c0_7 = arith.constant 0 : index
    %c0_8 = arith.constant 0 : index
    %16 = vector.load %arg3[%c0_7, %c0_8] : memref<8x128xf32, #tpu.memory_space<vmem>>, vector<8x32xf32>
    %c0_9 = arith.constant 0 : index
    %c64 = arith.constant 64 : index
    %17 = vector.load %arg3[%c0_9, %c64] : memref<8x128xf32, #tpu.memory_space<vmem>>, vector<8x32xf32>
    %18 = tpu.concatenate %7, %16 in 1 : vector<8x32xf32>, vector<8x32xf32> -> vector<8x64xf32>
    %cst_10 = arith.constant dense<0.000000e+00> : vector<8x128xf32>
    %19 = tpu.matmul %18, %14, %cst_10 {dimension_numbers = #tpu.dot_dimension_numbers<[1], [0], [0], [1], [0, 0, 1, 1], [], []>} : vector<8x64xf32>, vector<64x128xf32>, vector<8x128xf32> -> vector<8x128xf32>
    %20 = vector.broadcast %15 : vector<1x128xf32> to vector<8x128xf32>
    %21 = arith.addf %19, %20 : vector<8x128xf32>
    %cst_11 = arith.constant 5.000000e-01 : f32
    %22 = vector.broadcast %cst_11 : f32 to vector<8x128xf32>
    %23 = arith.mulf %21, %22 : vector<8x128xf32>
    %24 = arith.select %13, %21, %23 : vector<8x128xi1>, vector<8x128xf32>
    %25 = math.tanh %24 : vector<8x128xf32>
    %cst_12 = arith.constant 1.000000e+00 : f32
    %26 = vector.broadcast %cst_12 : f32 to vector<8x128xf32>
    %27 = arith.addf %25, %26 : vector<8x128xf32>
    %cst_13 = arith.constant 5.000000e-01 : f32
    %28 = vector.broadcast %cst_13 : f32 to vector<8x128xf32>
    %29 = arith.mulf %28, %27 : vector<8x128xf32>
    %30 = arith.select %13, %25, %29 : vector<8x128xi1>, vector<8x128xf32>
    %31 = vector.extract_strided_slice %30 {offsets = [0, 0], sizes = [8, 32], strides = [1, 1]} : vector<8x128xf32> to vector<8x32xf32>
    %32 = vector.extract_strided_slice %30 {offsets = [0, 32], sizes = [8, 32], strides = [1, 1]} : vector<8x128xf32> to vector<8x32xf32>
    %33 = vector.extract_strided_slice %30 {offsets = [0, 64], sizes = [8, 32], strides = [1, 1]} : vector<8x128xf32> to vector<8x32xf32>
    %34 = vector.extract_strided_slice %30 {offsets = [0, 96], sizes = [8, 32], strides = [1, 1]} : vector<8x128xf32> to vector<8x32xf32>
    %35 = arith.mulf %32, %17 : vector<8x32xf32>
    %36 = arith.mulf %31, %33 : vector<8x32xf32>
    %37 = arith.addf %35, %36 : vector<8x32xf32>
    %38 = math.tanh %37 : vector<8x32xf32>
    %39 = arith.mulf %34, %38 : vector<8x32xf32>
    %c0_14 = arith.constant 0 : index
    %c0_15 = arith.constant 0 : index
    %40 = vector.load %arg8[%c0_14, %c0_15] : memref<64x128xf32, #tpu.memory_space<vmem>>, vector<64x128xf32>
    %c0_16 = arith.constant 0 : index
    %c0_17 = arith.constant 0 : index
    %41 = vector.load %arg9[%c0_16, %c0_17] : memref<1x128xf32, #tpu.memory_space<vmem>>, vector<1x128xf32>
    %c0_18 = arith.constant 0 : index
    %c32 = arith.constant 32 : index
    %42 = vector.load %arg3[%c0_18, %c32] : memref<8x128xf32, #tpu.memory_space<vmem>>, vector<8x32xf32>
    %c0_19 = arith.constant 0 : index
    %c96 = arith.constant 96 : index
    %43 = vector.load %arg3[%c0_19, %c96] : memref<8x128xf32, #tpu.memory_space<vmem>>, vector<8x32xf32>
    %44 = tpu.concatenate %39, %42 in 1 : vector<8x32xf32>, vector<8x32xf32> -> vector<8x64xf32>
    %cst_20 = arith.constant dense<0.000000e+00> : vector<8x128xf32>
    %45 = tpu.matmul %44, %40, %cst_20 {dimension_numbers = #tpu.dot_dimension_numbers<[1], [0], [0], [1], [0, 0, 1, 1], [], []>} : vector<8x64xf32>, vector<64x128xf32>, vector<8x128xf32> -> vector<8x128xf32>
    %46 = vector.broadcast %41 : vector<1x128xf32> to vector<8x128xf32>
    %47 = arith.addf %45, %46 : vector<8x128xf32>
    %cst_21 = arith.constant 5.000000e-01 : f32
    %48 = vector.broadcast %cst_21 : f32 to vector<8x128xf32>
    %49 = arith.mulf %47, %48 : vector<8x128xf32>
    %50 = arith.select %13, %47, %49 : vector<8x128xi1>, vector<8x128xf32>
    %51 = math.tanh %50 : vector<8x128xf32>
    %cst_22 = arith.constant 1.000000e+00 : f32
    %52 = vector.broadcast %cst_22 : f32 to vector<8x128xf32>
    %53 = arith.addf %51, %52 : vector<8x128xf32>
    %cst_23 = arith.constant 5.000000e-01 : f32
    %54 = vector.broadcast %cst_23 : f32 to vector<8x128xf32>
    %55 = arith.mulf %54, %53 : vector<8x128xf32>
    %56 = arith.select %13, %51, %55 : vector<8x128xi1>, vector<8x128xf32>
    %57 = vector.extract_strided_slice %56 {offsets = [0, 0], sizes = [8, 32], strides = [1, 1]} : vector<8x128xf32> to vector<8x32xf32>
    %58 = vector.extract_strided_slice %56 {offsets = [0, 32], sizes = [8, 32], strides = [1, 1]} : vector<8x128xf32> to vector<8x32xf32>
    %59 = vector.extract_strided_slice %56 {offsets = [0, 64], sizes = [8, 32], strides = [1, 1]} : vector<8x128xf32> to vector<8x32xf32>
    %60 = vector.extract_strided_slice %56 {offsets = [0, 96], sizes = [8, 32], strides = [1, 1]} : vector<8x128xf32> to vector<8x32xf32>
    %61 = arith.mulf %58, %43 : vector<8x32xf32>
    %62 = arith.mulf %57, %59 : vector<8x32xf32>
    %63 = arith.addf %61, %62 : vector<8x32xf32>
    %64 = math.tanh %63 : vector<8x32xf32>
    %65 = arith.mulf %60, %64 : vector<8x32xf32>
    %66 = tpu.concatenate %39, %65, %37, %63 in 1 : vector<8x32xf32>, vector<8x32xf32>, vector<8x32xf32>, vector<8x32xf32> -> vector<8x128xf32>
    %c0_24 = arith.constant 0 : index
    %c0_25 = arith.constant 0 : index
    %67 = vector.load %arg13[%c0_24, %c0_25] : memref<8x128xf32, #tpu.memory_space<vmem>>, vector<8x128xf32>
    tpu.vector_store %arg13[%c0_24, %c0_25], %66 {strides = array<i32>} : memref<8x128xf32, #tpu.memory_space<vmem>>, vector<8x128xf32>,
    %c0_26 = arith.constant 0 : index
    %c0_27 = arith.constant 0 : index
    %68 = vector.load %arg5[%c0_26, %c0_27] : memref<8x64xf32, #tpu.memory_space<vmem>>, vector<8x32xf32>
    %c0_28 = arith.constant 0 : index
    %c32_29 = arith.constant 32 : index
    %69 = vector.load %arg5[%c0_28, %c32_29] : memref<8x64xf32, #tpu.memory_space<vmem>>, vector<8x32xf32>
    %70 = arith.mulf %65, %68 : vector<8x32xf32>
    %cst_30 = arith.constant dense<0.000000e+00> : vector<8xf32>
    %71 = vector.multi_reduction <add>, %70, %cst_30 [1] : vector<8x32xf32> to vector<8xf32>
    %72 = vector.shape_cast %71 : vector<8xf32> to vector<8x1xf32>
    %73 = arith.mulf %65, %69 : vector<8x32xf32>
    %cst_31 = arith.constant dense<0.000000e+00> : vector<8xf32>
    %74 = vector.multi_reduction <add>, %73, %cst_31 [1] : vector<8x32xf32> to vector<8xf32>
    %75 = vector.shape_cast %74 : vector<8xf32> to vector<8x1xf32>
    %76 = arith.maximumf %72, %75 : vector<8x1xf32>
    %77 = arith.subf %72, %76 : vector<8x1xf32>
    %78 = math.exp %77 : vector<8x1xf32>
    %79 = arith.subf %75, %76 : vector<8x1xf32>
    %80 = math.exp %79 : vector<8x1xf32>
    %81 = arith.addf %78, %80 : vector<8x1xf32>
    %82 = tpu.reciprocal %81 {approx = true} : vector<8x1xf32> -> vector<8x1xf32>
    %83 = vector.broadcast %78 : vector<8x1xf32> to vector<8x32xf32>
    %84 = arith.mulf %83, %68 : vector<8x32xf32>
    %85 = vector.broadcast %80 : vector<8x1xf32> to vector<8x32xf32>
    %86 = arith.mulf %85, %69 : vector<8x32xf32>
    %87 = arith.addf %84, %86 : vector<8x32xf32>
    %88 = vector.broadcast %82 : vector<8x1xf32> to vector<8x32xf32>
    %89 = arith.mulf %87, %88 : vector<8x32xf32>
    %90 = tpu.concatenate %89, %65 in 1 : vector<8x32xf32>, vector<8x32xf32> -> vector<8x64xf32>
    %c0_32 = arith.constant 0 : index
    %c0_33 = arith.constant 0 : index
    %91 = vector.load %arg10[%c0_32, %c0_33] : memref<64x32xf32, #tpu.memory_space<vmem>>, vector<64x32xf32>
    %cst_34 = arith.constant dense<0.000000e+00> : vector<8x32xf32>
    %92 = tpu.matmul %90, %91, %cst_34 {dimension_numbers = #tpu.dot_dimension_numbers<[1], [0], [0], [1], [0, 0, 1, 1], [], []>} : vector<8x64xf32>, vector<64x32xf32>, vector<8x32xf32> -> vector<8x32xf32>
    %93 = math.tanh %92 : vector<8x32xf32>
    %94 = tpu.concatenate %93, %65 in 1 : vector<8x32xf32>, vector<8x32xf32> -> vector<8x64xf32>
    %c0_35 = arith.constant 0 : index
    %c0_36 = arith.constant 0 : index
    %95 = vector.load %arg11[%c0_35, %c0_36] : memref<64x128xf32, #tpu.memory_space<vmem>>, vector<64x128xf32>
    %cst_37 = arith.constant dense<0.000000e+00> : vector<8x128xf32>
    %96 = tpu.matmul %94, %95, %cst_37 {dimension_numbers = #tpu.dot_dimension_numbers<[1], [0], [0], [1], [0, 0, 1, 1], [], []>} : vector<8x64xf32>, vector<64x128xf32>, vector<8x128xf32> -> vector<8x128xf32>
    %c0_38 = arith.constant 0 : index
    %c0_39 = arith.constant 0 : index
    %97 = vector.load %arg4[%c0_38, %c0_39] : memref<1x128xf32, #tpu.memory_space<vmem>>, vector<1x128xf32>
    %98 = vector.broadcast %97 : vector<1x128xf32> to vector<8x128xf32>
    %99 = arith.addf %96, %98 : vector<8x128xf32>
    %c0_40 = arith.constant 0 : index
    %c0_41 = arith.constant 0 : index
    %100 = vector.load %arg12[%c0_40, %c0_41] : memref<8x128xf32, #tpu.memory_space<vmem>>, vector<8x128xf32>
    tpu.vector_store %arg12[%c0_40, %c0_41], %99 {strides = array<i32>} : memref<8x128xf32, #tpu.memory_space<vmem>>, vector<8x128xf32>,
    return
  }
  func.func @transform_0(%arg0: i32) -> (i32, i32) {
    %c0_i32 = arith.constant 0 : i32
    %c0_i32_0 = arith.constant 0 : i32
    %c0_i32_1 = arith.constant 0 : i32
    return %c0_i32, %c0_i32_0 : i32, i32
  }
  func.func @transform_1(%arg0: i32) -> (i32, i32) {
    %c0_i32 = arith.constant 0 : i32
    %c0_i32_0 = arith.constant 0 : i32
    %c0_i32_1 = arith.constant 0 : i32
    return %c0_i32, %c0_i32_0 : i32, i32
  }
  func.func @transform_2(%arg0: i32) -> (i32, i32) {
    %c0_i32 = arith.constant 0 : i32
    %c0_i32_0 = arith.constant 0 : i32
    %c0_i32_1 = arith.constant 0 : i32
    return %c0_i32, %c0_i32_0 : i32, i32
  }
  func.func @transform_3(%arg0: i32) -> (i32, i32) {
    %c0_i32 = arith.constant 0 : i32
    %c0_i32_0 = arith.constant 0 : i32
    %c0_i32_1 = arith.constant 0 : i32
    return %c0_i32, %c0_i32_0 : i32, i32
  }
  func.func @transform_4(%arg0: i32) -> (i32, i32) {
    %c0_i32 = arith.constant 0 : i32
    %c0_i32_0 = arith.constant 0 : i32
    %c0_i32_1 = arith.constant 0 : i32
    return %c0_i32, %c0_i32_0 : i32, i32
  }
  func.func @transform_5(%arg0: i32) -> (i32, i32) {
    %c0_i32 = arith.constant 0 : i32
    %c0_i32_0 = arith.constant 0 : i32
    %c0_i32_1 = arith.constant 0 : i32
    return %c0_i32, %c0_i32_0 : i32, i32
  }
  func.func @transform_6(%arg0: i32) -> (i32, i32) {
    %c0_i32 = arith.constant 0 : i32
    %c0_i32_0 = arith.constant 0 : i32
    %c0_i32_1 = arith.constant 0 : i32
    return %c0_i32, %c0_i32_0 : i32, i32
  }
  func.func @transform_7(%arg0: i32) -> (i32, i32) {
    %c0_i32 = arith.constant 0 : i32
    %c0_i32_0 = arith.constant 0 : i32
    %c0_i32_1 = arith.constant 0 : i32
    return %c0_i32, %c0_i32_0 : i32, i32
  }
  func.func @transform_8(%arg0: i32) -> (i32, i32) {
    %c0_i32 = arith.constant 0 : i32
    %c0_i32_0 = arith.constant 0 : i32
    %c0_i32_1 = arith.constant 0 : i32
    return %c0_i32, %c0_i32_0 : i32, i32
  }
  func.func @transform_9(%arg0: i32) -> (i32, i32) {
    %c0_i32 = arith.constant 0 : i32
    %c0_i32_0 = arith.constant 0 : i32
    %c0_i32_1 = arith.constant 0 : i32
    return %c0_i32, %c0_i32_0 : i32, i32
  }
  func.func @transform_10(%arg0: i32) -> (i32, i32) {
    %c0_i32 = arith.constant 0 : i32
    %c0_i32_0 = arith.constant 0 : i32
    %c0_i32_1 = arith.constant 0 : i32
    return %c0_i32, %c0_i32_0 : i32, i32
  }
  func.func @transform_11(%arg0: i32) -> (i32, i32) {
    %c0_i32 = arith.constant 0 : i32
    %c0_i32_0 = arith.constant 0 : i32
    %c0_i32_1 = arith.constant 0 : i32
    return %c0_i32, %c0_i32_0 : i32, i32
  }
  func.func @transform_12(%arg0: i32) -> (i32, i32) {
    %c0_i32 = arith.constant 0 : i32
    %c0_i32_0 = arith.constant 0 : i32
    %c0_i32_1 = arith.constant 0 : i32
    return %c0_i32, %c0_i32_0 : i32, i32
  }
}

</mosaic_0001>

<bundles_post_ra>
// kernel: decoder_step.1
= control target key start
LH: loop header
LB: loop body
LE: loop exit
PB: predicated region body
PF: predicated region fallthrough
CT: control target
= control target key end

     0   :  { %18 = vsyncpa [#allocation3], 0  ;;  %s815_s0 = inlined_call_operand.vmem [shape: s32[8,1], index: 0, kind: input, shape index: {}]   ;;  %s816_s1 = inlined_call_operand.vmem [shape: f32[128,32], index: 1, kind: input, shape index: {}]   ;;  %s817_s2 = inlined_call_operand.hbm [shape: f32[8,128], index: 2, kind: input, shape index: {}, may-alias: {2,12}]   ;;  %s818_s3 = inlined_call_operand.vmem [shape: f32[1,128], index: 3, kind: input, shape index: {}]   ;;  %s819_s4 = inlined_call_operand.vmem [shape: f32[8,64], index: 4, kind: input, shape index: {}]   ;;  %s820_s5 = inlined_call_operand.vmem [shape: f32[64,128], index: 5, kind: input, shape index: {}]   ;;  %s821_s6 = inlined_call_operand.vmem [shape: f32[1,128], index: 6, kind: input, shape index: {}]   ;;  %s822_s7 = inlined_call_operand.vmem [shape: f32[64,128], index: 7, kind: input, shape index: {}]   ;;  %s823_s8 = inlined_call_operand.vmem [shape: f32[1,128], index: 8, kind: input, shape index: {}]   ;;  %s824_s9 = inlined_call_operand.vmem [shape: f32[64,32], index: 9, kind: input, shape index: {}]   ;;  %s825_s10 = inlined_call_operand.vmem [shape: f32[64,128], index: 10, kind: input, shape index: {}]   ;;  %s826_s11 = inlined_call_operand.hbm [shape: f32[8,128], index: 11, kind: output, shape index: {0}]   ;;  %s827_s12 = inlined_call_operand.hbm [shape: f32[8,128], index: 12, kind: output, shape index: {1}, may-alias: {2,12}]  }
   0x1   :  { %19 = vsyncpa [#allocation4], 0 }
   0x2   :  { %20 = vsyncpa [#allocation7], 0  ;;  %s30_s23 = sshll.u32 %s817_s2, 4  ;;  %s512_s24 = smov [#allocation2]   ;;  %s31_s23 = int_to_ptr.hbm [resolvable:$true] %s30_s23 }
   0x3   :  { %s32_s25 = sshll.u32 %s512_s24, 4  ;;  %s33_s25 = int_to_ptr.vmem [resolvable:$true] %s32_s25 }
   0x4   :  { %35 = dma.hbm_to_vmem [thread:$0]  %s31_s23, 128, %s33_s25, [#allocation3]  }
   0x5   :  { %506 = dma.done.wait [#allocation3], 128  }
   0x6   :  { %507 = vsyncadd [#allocation3], 4294967168  ;;  %v513_v0 = vmov 0   ;;  %v56_v1 = vld [vmem:[%s815_s0] sm:$0xff]  ;;  %v80_v2 = vld [vmem:[%s816_s1 + $0x78] sm:$0xff]  ;;  %s514_s24 = smov 32   ;;  %v57_v26 = vlaneseq }
   0x7   :  { %414 = vset.pattern.permute.xlu0 %v513_v0  ;;  %v79_v3 = vld [vmem:[%s816_s1 + $0x70] sm:$0xff]  ;;  %81 = vmatpush.msra.mxu0 %v80_v2  ;;  %v78_v4 = vld [vmem:[%s816_s1 + $0x68] sm:$0xff]  ;;  %v77_v5 = vld [vmem:[%s816_s1 + $0x60] sm:$0xff]  ;;  %v515_v29 = vmov 1.0   ;;  %vm118_vm1 = vcmask 261120   ;;  %vm123_vm2 = vcmask 523264  }
   0x8   :  { %60 = vperm.xlu0 %414, %v56_v1   ;;  %v76_v6 = vld [vmem:[%s816_s1 + $0x58] sm:$0xff]  ;;  %v75_v7 = vld [vmem:[%s816_s1 + $0x50] sm:$0xff]  ;;  %v74_v8 = vld [vmem:[%s816_s1 + $0x48] sm:$0xff]  ;;  %v58_v27 = vand.u32 127, %v57_v26  ;;  %vm253_vm6 = vcmask 785408   ;;  %s518_s20 = smov [#allocation6]  }
   0x9   :  { %82 = vmatpush.msra.mxu0 %v79_v3  ;;  %v73_v9 = vld [vmem:[%s816_s1 + $0x40] sm:$0xff]  ;;  %v72_v10 = vld [vmem:[%s816_s1 + $0x38] sm:$0xff]  ;;  %v71_v11 = vld [vmem:[%s816_s1 + $0x30] sm:$0xff]  ;;  %s383_s21 = sshll.u32 %s518_s20, 4  ;;  %s385_s25 = sshll.u32 %s827_s12, 4  ;;  %s384_s21 = int_to_ptr.vmem [resolvable:$true] %s383_s21  ;;  %s386_s25 = int_to_ptr.hbm [resolvable:$true] %s385_s25 }
   0xa   :  { %v70_v12 = vld [vmem:[%s816_s1 + $0x28] sm:$0xff]  ;;  %v69_v13 = vld [vmem:[%s816_s1 + $0x20] sm:$0xff]  ;;  %v68_v14 = vld [vmem:[%s816_s1 + $0x18] sm:$0xff]  ;;  %vm101_vm3 = vcmp.ge.s32.totalorder %v58_v27, 64  ;;  %vm102_vm4 = vcmp.lt.s32.totalorder %v58_v27, 96 }
   0xb   :  { %83 = vmatpush.msra.mxu0 %v78_v4  ;;  %v67_v15 = vld [vmem:[%s816_s1 + $0x10] sm:$0xff]  ;;  %v66_v16 = vld [vmem:[%s816_s1 + $0x8] sm:$0xff]  ;;  %v65_v17 = vld [vmem:[%s816_s1] sm:$0xff]  ;;  %s519_s1 = smov [#allocation5]  }
   0xc   :  { %v639_v18 = vld [vmem:[#allocation2] sm:$0xff]  ;;  %v111_v19 = vld [vmem:[%s820_s5 + $0x38] sm:$0xff]  ;;  %v110_v20 = vld [vmem:[%s820_s5 + $0x30] sm:$0xff] }
   0xd   :  { %84 = vmatpush.msra.mxu0 %v77_v5  ;;  %135 = vmatpush.msra.mxu1 %v111_v19  ;;  %v109_v21 = vld [vmem:[%s820_s5 + $0x28] sm:$0xff]  ;;  %v108_v22 = vld [vmem:[%s820_s5 + $0x20] sm:$0xff]  ;;  %v107_v23 = vld [vmem:[%s820_s5 + $0x18] sm:$0xff] }
   0xe   :  { %v106_v24 = vld [vmem:[%s820_s5 + $0x10] sm:$0xff]  ;;  %v105_v25 = vld [vmem:[%s820_s5 + $0x8] sm:$0xff]  ;;  %v104_v30 = vld [vmem:[%s820_s5] sm:$0xff]  ;;  %s516_s5 = smov 64  }
   0xf   :  { %85 = vmatpush.msra.mxu0 %v76_v6  ;;  %136 = vmatpush.msra.mxu1 %v110_v20  ;;  %v415_v34 = vld [vmem:[%s821_s6] ss:$0 sm:$0xff]  ;;  %vm672_vm5 = vmand %vm101_vm3, %vm102_vm4  ;;  %s517_s6 = smov 96   ;;  %v180_v51 = vld [vmem:[%s822_s7 + $0x38] sm:$0xff] }
  0x10   :  { %115 = vrot.lane.b32.xlu0 %v639_v18, %s514_s24  ;;  %v179_v52 = vld [vmem:[%s822_s7 + $0x30] sm:$0xff]  ;;  %201 = vmatpush.msra.mxu2 %v180_v51  ;;  %v178_v53 = vld [vmem:[%s822_s7 + $0x28] sm:$0xff]  ;;  %v177_v54 = vld [vmem:[%s822_s7 + $0x20] sm:$0xff] }
  0x11   :  { %86 = vmatpush.msra.mxu0 %v75_v7  ;;  %137 = vmatpush.msra.mxu1 %v109_v21  ;;  %v176_v55 = vld [vmem:[%s822_s7 + $0x18] sm:$0xff]  ;;  %v175_v56 = vld [vmem:[%s822_s7 + $0x10] sm:$0xff]  ;;  %v174_v57 = vld [vmem:[%s822_s7 + $0x8] sm:$0xff] }
  0x12   :  { %202 = vmatpush.msra.mxu2 %v179_v52  ;;  %v173_v60 = vld [vmem:[%s822_s7] sm:$0xff] }
  0x13   :  { %87 = vmatpush.msra.mxu0 %v74_v8  ;;  %138 = vmatpush.msra.mxu1 %v108_v22  ;;  %v416_v63 = vld [vmem:[%s823_s8] ss:$0 sm:$0xff] }
  0x14   :  { %203 = vmatpush.msra.mxu2 %v178_v53 }
  0x15   :  { %88 = vmatpush.msra.mxu0 %v73_v9  ;;  %139 = vmatpush.msra.mxu1 %v107_v23 }
  0x16   :  { %204 = vmatpush.msra.mxu2 %v177_v54 }
  0x17   :  { %89 = vmatpush.msra.mxu0 %v72_v10  ;;  %140 = vmatpush.msra.mxu1 %v106_v24  ;;  %v733_v10 = vld [vmem:[%s819_s4] sm:$0xff] }
  0x18   :  { %205 = vmatpush.msra.mxu2 %v176_v55 }
  0x19   :  { %90 = vmatpush.msra.mxu0 %v71_v11  ;;  %141 = vmatpush.msra.mxu1 %v105_v25 }
  0x1a   :  { %206 = vmatpush.msra.mxu2 %v175_v56 }
  0x1b   :  { %91 = vmatpush.msra.mxu0 %v70_v12  ;;  %142 = vmatpush.msra.mxu1 %v104_v30 }
  0x1c   :  { %207 = vmatpush.msra.mxu2 %v174_v57 }
  0x1d   :  { %92 = vmatpush.msra.mxu0 %v69_v13 }
  0x1e   :  { %208 = vmatpush.msra.mxu2 %v173_v60  ;;  %v335_v60 = vld [vmem:[%s825_s10 + $0x20] sm:$0xff] }
  0x1f   :  { %93 = vmatpush.msra.mxu0 %v68_v14 }
  0x21   :  { %94 = vmatpush.msra.mxu0 %v67_v15 }
  0x23   :  { %95 = vmatpush.msra.mxu0 %v66_v16 }
  0x25   :  { %96 = vmatpush.msra.mxu0 %v65_v17 }
  0x7a   :  { %v61_v28 = vpop.permute.xlu0 %60 }
  0x7b   :  { %vm62_vm0 = vcmp.eq.s32.totalorder %v58_v27, %v61_v28 }
  0x7c   :  { %401 = vmatmul.msk.f32.vlgmr.msra.gmra.mxu0 %vm62_vm0, %v515_v29 }
  0x82   :  { %v116_v31 = vpop.permute.xlu0 %115 }
  0xf9   :  { %v98_v32 = vpop.f32.mrf.mxu0 }
  0xfa   :  { %v119_v33 = vsel %vm118_vm1, %v98_v32, %v116_v31 }
  0xfb   :  { %402 = vmatmul.msk.f32.vlgmr.msra.gmra.mxu1 %vm123_vm2, %v119_v33  ;;  %v305_v33 = vld [vmem:[%s824_s9 + $0x38] sm:$0xff] }
  0xfc   :  { %317 = vmatpush.msra.mxu3 %v305_v33 }
 0x178   :  { %v144_v35 = vpop.f32.mrf.mxu1 }
 0x179   :  { %v145_v36 = vadd.f32 %v415_v34, %v144_v35  ;;  %v304_v34 = vld [vmem:[%s824_s9 + $0x30] sm:$0xff]  ;;  %v303_v35 = vld [vmem:[%s824_s9 + $0x28] sm:$0xff] }
 0x17a   :  { %318 = vmatpush.msra.mxu3 %v304_v34 }
 0x17b   :  { %v147_v38 = vmul.f32 0.5, %v145_v36 }
 0x17c   :  { %319 = vmatpush.msra.mxu3 %v303_v35 }
 0x17d   :  { %v148_v39 = vsel %vm672_vm5, %v145_v36, %v147_v38 }
 0x17e   :  { %418 = vtanh.f32 %v148_v39 }
 0x184   :  { %v419_v40 = vpop.eup %418 }
 0x185   :  { %v150_v41 = vadd.f32 1.0, %v419_v40 }
 0x187   :  { %v151_v42 = vmul.f32 0.5, %v150_v41  ;;  %v301_v41 = vld [vmem:[%s824_s9 + $0x18] sm:$0xff] }
 0x189   :  { %v152_v43 = vsel %vm672_vm5, %v419_v40, %v151_v42  ;;  %v302_v40 = vld [vmem:[%s824_s9 + $0x20] sm:$0xff]  ;;  %v300_v42 = vld [vmem:[%s824_s9 + $0x10] sm:$0xff] }
 0x18a   :  { %158 = vrot.lane.b32.xlu1 %v152_v43, %s516_s5  ;;  %320 = vmatpush.msra.mxu3 %v302_v40 }
 0x18c   :  { %321 = vmatpush.msra.mxu3 %v301_v41 }
 0x18e   :  { %322 = vmatpush.msra.mxu3 %v300_v42 }
 0x192   :  { %153 = vrot.lane.b32.xlu1 %v639_v18, %s517_s6 }
 0x1fc   :  { %v159_v44 = vpop.permute.xlu1 %158 }
 0x1fd   :  { %v161_v45 = vmul.f32 %v159_v44, %v152_v43  ;;  %v298_v44 = vld [vmem:[%s824_s9] sm:$0xff] }
 0x1ff   :  { %163 = vrot.lane.b32.xlu2 %v161_v45, %s514_s24  ;;  %v338_v45 = vld [vmem:[%s825_s10 + $0x38] sm:$0xff] }
 0x200   :  { %354 = vmatpush.msrb.mxu1 %v338_v45 }
 0x204   :  { %v154_v46 = vpop.permute.xlu1 %153 }
 0x205   :  { %v156_v47 = vmul.f32 %v154_v46, %v152_v43  ;;  %v337_v46 = vld [vmem:[%s825_s10 + $0x30] sm:$0xff] }
 0x206   :  { %355 = vmatpush.msrb.mxu1 %v337_v46 }
 0x259   :  { %v164_v48 = vpop.permute.xlu2 %163 }
 0x25a   :  { %v684_v49 = vadd.f32 %v164_v48, %v156_v47  ;;  %v336_v47 = vld [vmem:[%s825_s10 + $0x28] sm:$0xff] }
 0x25b   :  { %356 = vmatpush.msrb.mxu1 %v336_v47 }
 0x25c   :  { %420 = vtanh.f32 %v684_v49 }
 0x25d   :  { %357 = vmatpush.msrb.mxu1 %v335_v60 }
 0x262   :  { %v421_v50 = vpop.eup %420 }
 0x263   :  { %169 = vrot.lane.b32.xlu2 %v421_v50, %s516_s5 }
 0x26b   :  { %219 = vrot.lane.b32.xlu2 %v639_v18, %s516_s5 }
 0x273   :  { %258 = vrot.lane.b32.xlu2 %v733_v10, %s517_s6 }
 0x2bd   :  { %v170_v58 = vpop.permute.xlu2 %169 }
 0x2be   :  { %v172_v59 = vmul.f32 %v170_v58, %v152_v43  ;;  %v299_v43 = vld [vmem:[%s824_s9 + $0x8] sm:$0xff] }
 0x2bf   :  { %323 = vmatpush.msra.mxu3 %v299_v43 }
 0x2c0   :  { %183 = vrot.lane.b32.xlu0 %v172_v59, %s514_s24 }
 0x2c1   :  { %324 = vmatpush.msra.mxu3 %v298_v44 }
 0x2c5   :  { %v220_v11 = vpop.permute.xlu2 %219 }
 0x332   :  { %v715_v61 = vpop.permute.xlu0 %183 }
 0x333   :  { %v186_v62 = vsel %vm118_vm1, %v715_v61, %v639_v18  ;;  %v259_v18 = vpop.permute.xlu2 %258 }
 0x334   :  { %403 = vmatmul.msk.f32.vlgmr.msra.gmra.mxu2 %vm123_vm2, %v186_v62  ;;  %v334_v62 = vld [vmem:[%s825_s10 + $0x18] sm:$0xff] }
 0x335   :  { %358 = vmatpush.msrb.mxu1 %v334_v62 }
 0x3b7   :  { %v210_v0 = vpop.f32.mrf.mxu2 }
 0x3b8   :  { %v211_v1 = vadd.f32 %v416_v63, %v210_v0  ;;  %v333_v63 = vld [vmem:[%s825_s10 + $0x10] sm:$0xff]  ;;  %v331_v0 = vld [vmem:[%s825_s10] sm:$0xff] }
 0x3b9   :  { %359 = vmatpush.msrb.mxu1 %v333_v63 }
 0x3ba   :  { %v213_v2 = vmul.f32 0.5, %v211_v1 }
 0x3bc   :  { %v214_v3 = vsel %vm672_vm5, %v211_v1, %v213_v2 }
 0x3bd   :  { %422 = vtanh.f32 %v214_v3 }
 0x3c3   :  { %v423_v4 = vpop.eup %422 }
 0x3c4   :  { %v216_v5 = vadd.f32 1.0, %v423_v4 }
 0x3c6   :  { %v217_v6 = vmul.f32 0.5, %v216_v5 }
 0x3c8   :  { %v218_v7 = vsel %vm672_vm5, %v423_v4, %v217_v6  ;;  %v417_v4 = vld [vmem:[%s818_s3] ss:$0 sm:$0xff] }
 0x3c9   :  { %224 = vrot.lane.b32.xlu1 %v218_v7, %s516_s5  ;;  %v222_v12 = vmul.f32 %v220_v11, %v218_v7 }
 0x43b   :  { %v225_v8 = vpop.permute.xlu1 %224 }
 0x43c   :  { %v227_v9 = vmul.f32 %v225_v8, %v218_v7 }
 0x43e   :  { %229 = vrot.lane.b32.xlu0 %v227_v9, %s514_s24 }
 0x446   :  { %269 = vrot.lane.b32.xlu0 %v733_v10, %s516_s5 }
 0x4b0   :  { %v230_v13 = vpop.permute.xlu0 %229 }
 0x4b1   :  { %v232_v14 = vadd.f32 %v230_v13, %v222_v12 }
 0x4b3   :  { %424 = vtanh.f32 %v232_v14 }
 0x4b8   :  { %v270_v16 = vpop.permute.xlu0 %269 }
 0x4b9   :  { %v425_v15 = vpop.eup %424 }
 0x4ba   :  { %235 = vrot.lane.b32.xlu1 %v425_v15, %s516_s5 }
 0x52c   :  { %v236_v17 = vpop.permute.xlu1 %235 }
 0x52d   :  { %v238_v19 = vmul.f32 %v236_v17, %v218_v7 }
 0x52f   :  { %v272_v20 = vmul.f32 %v270_v16, %v238_v19  ;;  %v261_v21 = vmul.f32 %v259_v18, %v238_v19 }
 0x531   :  { %274 = vrot.lane.b32.xlu2 %v272_v20, %s514_s24  ;;  %263 = vrot.lane.b32.xlu1 %v261_v21, %s514_s24 }
 0x58b   :  { %v275_v22 = vpop.permute.xlu2 %274 }
 0x58c   :  { %v277_v23 = vsel %vm118_vm1, %v275_v22, 0.0 }
 0x58d   :  { %278 = vadd.xlane.f32.xlu1 %v277_v23 }
 0x5a3   :  { %v264_v24 = vpop.permute.xlu1 %263 }
 0x5a4   :  { %v266_v25 = vsel %vm118_vm1, %v264_v24, 0.0 }
 0x5a5   :  { %267 = vadd.xlane.f32.xlu0 %v266_v25 }
 0x600   :  { %v279_v26 = vpop.xlane.xlu1 %278 }
 0x618   :  { %v268_v27 = vpop.xlane.xlu0 %267 }
 0x619   :  { %v280_v28 = vmax.f32 %v268_v27, %v279_v26 }
 0x61b   :  { %v281_v29 = vsub.f32 %v268_v27, %v280_v28  ;;  %v284_v30 = vsub.f32 %v279_v26, %v280_v28 }
 0x61d   :  { %v282_v31 = vmul.f32 1.442695, %v281_v29  ;;  %v285_v32 = vmul.f32 1.442695, %v284_v30 }
 0x61f   :  { %426 = vpow2.f32 %v282_v31 }
 0x620   :  { %428 = vpow2.f32 %v285_v32 }
 0x625   :  { %v427_v36 = vpop.eup %426 }
 0x626   :  { %v429_v37 = vpop.eup %428  ;;  %v289_v48 = vmul.f32 %v427_v36, %v733_v10 }
 0x627   :  { %v287_v38 = vadd.f32 %v429_v37, %v427_v36  ;;  %v290_v39 = vmul.f32 %v429_v37, %v733_v10 }
 0x629   :  { %292 = vrot.lane.b32.xlu2 %v290_v39, %s517_s6  ;;  %430 = vrcp.f32 %v287_v38  ;;  %s372_s6 = sshll.u32 %s519_s1, 4  ;;  %s373_s6 = int_to_ptr.vmem [resolvable:$true] %s372_s6 }
 0x62f   :  { %v431_v51 = vpop.eup %430 }
 0x631   :  { %240 = vrot.lane.b32.xlu2 %v238_v19, %s516_s5 }
 0x639   :  { %244 = vrot.lane.b32.xlu2 %v684_v49, %s514_s24 }
 0x641   :  { %248 = vrot.lane.b32.xlu2 %v232_v14, %s516_s5  ;;  %s374_s5 = sshll.u32 %s826_s11, 4  ;;  %s375_s5 = int_to_ptr.hbm [resolvable:$true] %s374_s5 }
 0x683   :  { %v293_v49 = vpop.permute.xlu2 %292 }
 0x684   :  { %v295_v50 = vadd.f32 %v293_v49, %v289_v48 }
 0x686   :  { %v296_v52 = vmul.f32 %v431_v51, %v295_v50 }
 0x68b   :  { %v241_v53 = vpop.permute.xlu2 %240 }
 0x68c   :  { %v297_v54 = vsel %vm118_vm1, %v296_v52, %v241_v53  ;;  %v251_v56 = vsel %vm118_vm1, %v715_v61, %v241_v53  ;;  %v332_v61 = vld [vmem:[%s825_s10 + $0x8] sm:$0xff] }
 0x68d   :  { %404 = vmatmul.msk.f32.vlgmr.msra.gmra.mxu3 %vm123_vm2, %v297_v54  ;;  %360 = vmatpush.msrb.mxu1 %v332_v61 }
 0x68f   :  { %361 = vmatpush.msrb.mxu1 %v331_v0 }
 0x693   :  { %v245_v55 = vpop.permute.xlu2 %244 }
 0x694   :  { %v252_v57 = vsel %vm123_vm2, %v251_v56, %v245_v55 }
 0x69b   :  { %v249_v58 = vpop.permute.xlu2 %248 }
 0x69c   :  { %v254_v59 = vsel %vm253_vm6, %v252_v57, %v249_v58 }
 0x69d   :  { %255 = vst [vmem:[#allocation6] sm:$0xff] %v254_v59 }
 0x69e   :  { %388 = dma.vmem_to_hbm [thread:$0]  %s384_s21, 128, %s386_s25, [#allocation7]  }
 0x710   :  { %v326_v1 = vpop.f32.mrf.mxu3 }
 0x711   :  { %432 = vtanh.f32 %v326_v1 }
 0x717   :  { %v433_v2 = vpop.eup %432 }
 0x718   :  { %v330_v3 = vsel %vm118_vm1, %v433_v2, %v241_v53 }
 0x719   :  { %405 = vmatmul.msk.f32.vlgmr.msrb.gmra.mxu1 %vm123_vm2, %v330_v3 }
 0x796   :  { %v363_v5 = vpop.f32.mrf.mxu1 }
 0x797   :  { %v364_v6 = vadd.f32 %v417_v4, %v363_v5 }
 0x799   :  { %366 = vst [vmem:[#allocation5] sm:$0xff] %v364_v6 }
 0x79a   :  { %377 = dma.vmem_to_hbm [thread:$0]  %s373_s6, 128, %s375_s5, [#allocation4]  }
 0x79b   :  { %508 = dma.done.wait [#allocation4], 128  }
 0x79c   :  { %509 = vsyncadd [#allocation4], 4294967168 }
 0x79d   :  { %510 = dma.done.wait [#allocation7], 128  }
 0x79e   :  { %511 = vsyncadd [#allocation7], 4294967168 }
 0x79f   :  { %397 = vsyncpa [#allocation3], 1 }
 0x7a0   :  { %398 = vsyncpa [#allocation4], 1 }
 0x7a1   :  { %399 = vsyncpa [#allocation7], 1 }

</bundles_post_ra>
